<compile_context>
chip_gen: v7x
topology: tpu7x:2x2x1
jax: 0.10.0
libtpu: 0.0.40
codegen_flags: <defaults>
</compile_context>

<pallas_src>
import jax
import jax.numpy as jnp
from jax.experimental import pallas as pl
from jax.experimental.pallas import tpu as pltpu

LANES = 128      # lane width of a vreg / MXU tile
SUBLANES = 8     # sublane count of a vreg
MAX_TILE = 2048  # keeps streamed blocks well under every gen's scoped-VMEM


def _round_up(x, m):
    return (x + m - 1) // m * m


# --------------------------------------------------------------------------
# Kernel
# --------------------------------------------------------------------------
def qnetwork_kernel(xu_ref, wp_ref, out_ref):
    """Fused twin-Q MLP: 3 wide bf16 MXU matmuls + VPU/XLU output layer."""
    K8 = xu_ref.shape[1]                 # padded (state+action) width
    f32 = jnp.float32
    cdt = wp_ref.dtype                   # bf16 compute dtype for the MXU

    # Static row offsets into the packed parameter buffer (see pack_params).
    r_w1 = 0
    r_w2 = r_w1 + K8
    r_w3 = r_w2 + LANES
    r_w4 = r_w3 + LANES
    r_b = r_w4 + SUBLANES

    w1 = wp_ref[r_w1:r_w1 + K8, :]        # (K8, 128)  [fc1 | fc5]
    w2 = wp_ref[r_w2:r_w2 + LANES, :]     # (128,128)  blkdiag(fc2, fc6)
    w3 = wp_ref[r_w3:r_w3 + LANES, :]     # (128,128)  blkdiag(fc3, fc7), col-padded
    w4a = wp_ref[r_w4 + 0:r_w4 + 1, :].astype(f32)   # (1,128) fc4 col, lanes [0,fc3)
    w4b = wp_ref[r_w4 + 1:r_w4 + 2, :].astype(f32)   # (1,128) fc8 col, lanes [fc3,2fc3)
    b1 = wp_ref[r_b + 0:r_b + 1, :].astype(f32)
    b2 = wp_ref[r_b + 1:r_b + 2, :].astype(f32)
    b3 = wp_ref[r_b + 2:r_b + 3, :].astype(f32)
    b4 = wp_ref[r_b + 3:r_b + 4, :].astype(f32)      # lanes 0/1 = fc4/fc8 biases

    # Layers 1-3: bf16 MXU matmuls, f32 accumulation, f32 bias/ReLU.
    h = jnp.dot(xu_ref[...], w1, preferred_element_type=f32) + b1
    h = jnp.maximum(h, 0.0)
    h = jnp.dot(h.astype(cdt), w2, preferred_element_type=f32) + b2
    h = jnp.maximum(h, 0.0)
    h = jnp.dot(h.astype(cdt), w3, preferred_element_type=f32) + b3
    h = jnp.maximum(h, 0.0)

    # Layer 4 off the MXU: elementwise multiply + lane reduction per head.
    q1 = jnp.sum(h * w4a, axis=-1, keepdims=True) + b4[:, 0:1]
    q2 = jnp.sum(h * w4b, axis=-1, keepdims=True) + b4[:, 1:2]
    out_ref[...] = jnp.concatenate([q1, q2], axis=1)   # (T, 2)


# --------------------------------------------------------------------------
# Parameter init + packing (param-prep time, not per forward call)
# --------------------------------------------------------------------------
def init_params(key, state_size, action_size,
                fc1_units=64, fc2_units=64, fc3_units=32):
    """Raw params (mimics nn.Linear uniform init); weights stored (in, out)."""
    in_dim = state_size + action_size
    dims = [
        (in_dim, fc1_units), (fc1_units, fc2_units),
        (fc2_units, fc3_units), (fc3_units, 1),
        (in_dim, fc1_units), (fc1_units, fc2_units),
        (fc2_units, fc3_units), (fc3_units, 1),
    ]
    params = []
    keys = jax.random.split(key, 2 * len(dims))
    for idx, (fan_in, fan_out) in enumerate(dims):
        bound = 1.0 / (fan_in ** 0.5)
        w = jax.random.uniform(
            keys[2 * idx], (fan_in, fan_out), jnp.float32, -bound, bound)
        b = jax.random.uniform(
            keys[2 * idx + 1], (1, fan_out), jnp.float32, -bound, bound)
        params.append(w)
        params.append(b)
    return params


def pack_params(params):
    """Fuse twin heads + pack everything into one (R, 128) bf16 buffer."""
    (w1, b1, w2, b2, w3, b3, w4, b4,
     w5, b5, w6, b6, w7, b7, w8, b8) = params
    K = w1.shape[0]
    K8 = _round_up(K, SUBLANES)
    fc1, fc2, fc3 = w1.shape[1], w2.shape[1], w3.shape[1]
    assert 2 * fc1 <= LANES and 2 * fc2 <= LANES and 2 * fc3 <= LANES, (
        "packed layout assumes fused hidden widths fit in one 128-lane tile")

    def place(block, rows):
        buf = jnp.zeros((rows, LANES), jnp.float32)
        return buf.at[:block.shape[0], :block.shape[1]].set(block)

    def block_diag(a, b):
        top = jnp.concatenate(
            [a, jnp.zeros((a.shape[0], b.shape[1]), jnp.float32)], axis=1)
        bot = jnp.concatenate(
            [jnp.zeros((b.shape[0], a.shape[1]), jnp.float32), b], axis=1)
        return jnp.concatenate([top, bot], axis=0)

    # Trunk weights, heads fused along the output (lane) dimension.
    w1_f = jnp.concatenate([w1, w5], axis=1)      # (K, 2*fc1)
    w2_f = block_diag(w2, w6)                     # (2fc1, 2fc2)
    w3_f = block_diag(w3, w7)                     # (2fc2, 2fc3)

    # Layer-4 reduction rows: row 0 -> Q1 lanes [0,fc3), row 1 -> Q2 lanes [fc3,2fc3).
    w4_rows = jnp.zeros((SUBLANES, LANES), jnp.float32)
    w4_rows = w4_rows.at[0, :fc3].set(w4[:, 0])
    w4_rows = w4_rows.at[1, fc3:2 * fc3].set(w8[:, 0])

    bias_block = jnp.zeros((SUBLANES, LANES), jnp.float32)
    bias_block = bias_block.at[0, :2 * fc1].set(jnp.concatenate([b1[0], b5[0]]))
    bias_block = bias_block.at[1, :2 * fc2].set(jnp.concatenate([b2[0], b6[0]]))
    bias_block = bias_block.at[2, :2 * fc3].set(jnp.concatenate([b3[0], b7[0]]))
    bias_block = bias_block.at[3, 0].set(b4[0, 0])
    bias_block = bias_block.at[3, 1].set(b8[0, 0])

    packed = jnp.concatenate([
        place(w1_f, K8),        # rows [0, K8)
        place(w2_f, LANES),     # rows [K8, K8+128)
        place(w3_f, LANES),     # rows [K8+128, K8+256)
        w4_rows,                # rows [K8+256, K8+264)
        bias_block,             # rows [K8+264, K8+272)
    ], axis=0)
    return packed.astype(jnp.bfloat16)


# --------------------------------------------------------------------------
# Forward wrappers
# --------------------------------------------------------------------------
def _choose_tile(batch):
    """Row tile: big (amortize per-step + MXU staging), >=2 steps when possible."""
    if batch <= SUBLANES:
        return SUBLANES
    half = _round_up((batch + 1) // 2, SUBLANES)   # >=2 grid steps for v7x's 2 TCs
    return max(SUBLANES, min(MAX_TILE, half))


def qnetwork_forward(state, action, packed_params):
    """Returns (q1, q2), each (B, 1) float32."""
    B, S = state.shape
    A = action.shape[1]
    K = S + A
    K8 = _round_up(K, SUBLANES)
    R = packed_params.shape[0]

    # Concatenate + cast once in the wrapper -> one streamed, lane-aligned input.
    xu = jnp.concatenate([state, action], axis=1).astype(jnp.bfloat16)
    T = _choose_tile(B)
    Bp = _round_up(B, T)
    pad_rows, pad_cols = Bp - B, K8 - K
    if pad_rows or pad_cols:
        xu = jnp.pad(xu, ((0, pad_rows), (0, pad_cols)))

    flops = 2 * Bp * (K8 * LANES + 2 * LANES * LANES + 2 * LANES)
    bytes_accessed = Bp * K8 * 2 + Bp * 2 * 4 + R * LANES * 2

    q = pl.pallas_call(
        qnetwork_kernel,
        out_shape=jax.ShapeDtypeStruct((Bp, 2), jnp.float32),
        grid=(Bp // T,),
        in_specs=[
            pl.BlockSpec((T, K8), lambda i: (i, 0)),
            # Packed params: constant block index -> one DMA, VMEM-resident.
            pl.BlockSpec((R, LANES), lambda i: (0, 0)),
        ],
        out_specs=pl.BlockSpec((T, 2), lambda i: (i, 0)),
        compiler_params=pltpu.CompilerParams(
            dimension_semantics=("parallel",)),
        cost_estimate=pl.CostEstimate(
            flops=flops, transcendentals=0, bytes_accessed=bytes_accessed),
    )(xu, packed_params)
    q = q[:B]
    return q[:, 0:1], q[:, 1:2]


def qnetwork_q1(state, action, packed_params):
    """Equivalent of QNetwork.Q1 (reuses the fused kernel)."""
    q1, _ = qnetwork_forward(state, action, packed_params)
    return q1


def reference_forward(state, action, params):
    """Pure-JAX f32 reference (mirrors the PyTorch forward) for verification."""
    (w1, b1, w2, b2, w3, b3, w4, b4,
     w5, b5, w6, b6, w7, b7, w8, b8) = params
    xu = jnp.concatenate([state, action], axis=1)
    x1 = jnp.maximum(xu @ w1 + b1, 0.0)
    x1 = jnp.maximum(x1 @ w2 + b2, 0.0)
    x1 = jnp.maximum(x1 @ w3 + b3, 0.0)
    x1 = x1 @ w4 + b4
    x2 = jnp.maximum(xu @ w5 + b5, 0.0)
    x2 = jnp.maximum(x2 @ w6 + b6, 0.0)
    x2 = jnp.maximum(x2 @ w7 + b7, 0.0)
    x2 = x2 @ w8 + b8
    return x1, x2


if __name__ == "__main__":
    batch = 8
    state_size = 12
    action_size = 4

    key = jax.random.PRNGKey(0)
    k_state, k_action, k_params = jax.random.split(key, 3)

    state = jax.random.normal(k_state, (batch, state_size), jnp.float32)
    action = jax.random.normal(k_action, (batch, action_size), jnp.float32)
    raw_params = init_params(k_params, state_size, action_size)
    packed = pack_params(raw_params)

    fwd = jax.jit(qnetwork_forward)
    q1, q2 = fwd(state, action, packed)
    jax.block_until_ready((q1, q2))

    r1, r2 = reference_forward(state, action, raw_params)
    assert q1.shape == (batch, 1) and q2.shape == (batch, 1)
    # bf16 matmul operands (f32 accumulation) -> relaxed tolerance vs f32 ref.
    assert jnp.allclose(q1, r1, atol=3e-2, rtol=3e-2)
    assert jnp.allclose(q2, r2, atol=3e-2, rtol=3e-2)

    # Q1-only path reuses the same fused kernel.
    q1_only = qnetwork_q1(state, action, packed)
    jax.block_until_ready(q1_only)
    assert jnp.allclose(q1_only, r1, atol=3e-2, rtol=3e-2)

    print("KERNEL_OK")
</pallas_src>

<mosaic_0001>
module attributes {stable_mosaic.version = 11 : i64} {
  func.func @qnetwork_kernel(%arg0: i32, %arg1: memref<8x16xbf16, #tpu.memory_space<vmem>>, %arg2: memref<288x128xbf16, #tpu.memory_space<vmem>>, %arg3: memref<8x2xf32, #tpu.memory_space<vmem>>) attributes {dimension_semantics = [#tpu.dimension_semantics<parallel>], iteration_bounds = array<i64: 1>, scalar_prefetch = 0 : i64, scratch_operands = 0 : i64, tpu.core_type = #tpu.core_type<tc>, window_params = [{transform_indices = @transform_0, window_bounds = array<i64: 8, 16>}, {pipeline_mode = #tpu.pipeline_mode<synchronous>, transform_indices = @transform_1, window_bounds = array<i64: 288, 128>}, {transform_indices = @transform_2, window_bounds = array<i64: 8, 2>}]} {
    %c0 = arith.constant 0 : index
    %c0_0 = arith.constant 0 : index
    %0 = vector.load %arg2[%c0, %c0_0] : memref<288x128xbf16, #tpu.memory_space<vmem>>, vector<16x128xbf16>
    %c16 = arith.constant 16 : index
    %c0_1 = arith.constant 0 : index
    %1 = vector.load %arg2[%c16, %c0_1] : memref<288x128xbf16, #tpu.memory_space<vmem>>, vector<128x128xbf16>
    %c144 = arith.constant 144 : index
    %c0_2 = arith.constant 0 : index
    %2 = vector.load %arg2[%c144, %c0_2] : memref<288x128xbf16, #tpu.memory_space<vmem>>, vector<128x128xbf16>
    %c272 = arith.constant 272 : index
    %c0_3 = arith.constant 0 : index
    %3 = vector.load %arg2[%c272, %c0_3] : memref<288x128xbf16, #tpu.memory_space<vmem>>, vector<1x128xbf16>
    %4 = arith.extf %3 : vector<1x128xbf16> to vector<1x128xf32>
    %c273 = arith.constant 273 : index
    %c0_4 = arith.constant 0 : index
    %5 = vector.load %arg2[%c273, %c0_4] : memref<288x128xbf16, #tpu.memory_space<vmem>>, vector<1x128xbf16>
    %6 = arith.extf %5 : vector<1x128xbf16> to vector<1x128xf32>
    %c280 = arith.constant 280 : index
    %c0_5 = arith.constant 0 : index
    %7 = vector.load %arg2[%c280, %c0_5] : memref<288x128xbf16, #tpu.memory_space<vmem>>, vector<1x128xbf16>
    %8 = arith.extf %7 : vector<1x128xbf16> to vector<1x128xf32>
    %c281 = arith.constant 281 : index
    %c0_6 = arith.constant 0 : index
    %9 = vector.load %arg2[%c281, %c0_6] : memref<288x128xbf16, #tpu.memory_space<vmem>>, vector<1x128xbf16>
    %10 = arith.extf %9 : vector<1x128xbf16> to vector<1x128xf32>
    %c282 = arith.constant 282 : index
    %c0_7 = arith.constant 0 : index
    %11 = vector.load %arg2[%c282, %c0_7] : memref<288x128xbf16, #tpu.memory_space<vmem>>, vector<1x128xbf16>
    %12 = arith.extf %11 : vector<1x128xbf16> to vector<1x128xf32>
    %c283 = arith.constant 283 : index
    %c0_8 = arith.constant 0 : index
    %13 = vector.load %arg2[%c283, %c0_8] : memref<288x128xbf16, #tpu.memory_space<vmem>>, vector<1x128xbf16>
    %14 = arith.extf %13 : vector<1x128xbf16> to vector<1x128xf32>
    %c0_9 = arith.constant 0 : index
    %c0_10 = arith.constant 0 : index
    %15 = vector.load %arg1[%c0_9, %c0_10] : memref<8x16xbf16, #tpu.memory_space<vmem>>, vector<8x16xbf16>
    %cst = arith.constant dense<0.000000e+00> : vector<8x128xf32>
    %16 = tpu.matmul %15, %0, %cst {dimension_numbers = #tpu.dot_dimension_numbers<[1], [0], [0], [1], [0, 0, 1, 1], [], []>} : vector<8x16xbf16>, vector<16x128xbf16>, vector<8x128xf32> -> vector<8x128xf32>
    %17 = vector.broadcast %8 : vector<1x128xf32> to vector<8x128xf32>
    %18 = arith.addf %16, %17 : vector<8x128xf32>
    %cst_11 = arith.constant 0.000000e+00 : f32
    %19 = vector.broadcast %cst_11 : f32 to vector<8x128xf32>
    %20 = arith.maximumf %18, %19 : vector<8x128xf32>
    %21 = arith.truncf %20 : vector<8x128xf32> to vector<8x128xbf16>
    %cst_12 = arith.constant dense<0.000000e+00> : vector<8x128xf32>
    %22 = tpu.matmul %21, %1, %cst_12 {dimension_numbers = #tpu.dot_dimension_numbers<[1], [0], [0], [1], [0, 0, 1, 1], [], []>} : vector<8x128xbf16>, vector<128x128xbf16>, vector<8x128xf32> -> vector<8x128xf32>
    %23 = vector.broadcast %10 : vector<1x128xf32> to vector<8x128xf32>
    %24 = arith.addf %22, %23 : vector<8x128xf32>
    %cst_13 = arith.constant 0.000000e+00 : f32
    %25 = vector.broadcast %cst_13 : f32 to vector<8x128xf32>
    %26 = arith.maximumf %24, %25 : vector<8x128xf32>
    %27 = arith.truncf %26 : vector<8x128xf32> to vector<8x128xbf16>
    %cst_14 = arith.constant dense<0.000000e+00> : vector<8x128xf32>
    %28 = tpu.matmul %27, %2, %cst_14 {dimension_numbers = #tpu.dot_dimension_numbers<[1], [0], [0], [1], [0, 0, 1, 1], [], []>} : vector<8x128xbf16>, vector<128x128xbf16>, vector<8x128xf32> -> vector<8x128xf32>
    %29 = vector.broadcast %12 : vector<1x128xf32> to vector<8x128xf32>
    %30 = arith.addf %28, %29 : vector<8x128xf32>
    %cst_15 = arith.constant 0.000000e+00 : f32
    %31 = vector.broadcast %cst_15 : f32 to vector<8x128xf32>
    %32 = arith.maximumf %30, %31 : vector<8x128xf32>
    %33 = vector.broadcast %4 : vector<1x128xf32> to vector<8x128xf32>
    %34 = arith.mulf %32, %33 : vector<8x128xf32>
    %cst_16 = arith.constant dense<0.000000e+00> : vector<8xf32>
    %35 = vector.multi_reduction <add>, %34, %cst_16 [1] : vector<8x128xf32> to vector<8xf32>
    %36 = vector.shape_cast %35 : vector<8xf32> to vector<8x1xf32>
    %37 = vector.extract_strided_slice %14 {offsets = [0, 0], sizes = [1, 1], strides = [1, 1]} : vector<1x128xf32> to vector<1x1xf32>
    %38 = vector.broadcast %37 : vector<1x1xf32> to vector<8x1xf32>
    %39 = arith.addf %36, %38 : vector<8x1xf32>
    %40 = vector.broadcast %6 : vector<1x128xf32> to vector<8x128xf32>
    %41 = arith.mulf %32, %40 : vector<8x128xf32>
    %cst_17 = arith.constant dense<0.000000e+00> : vector<8xf32>
    %42 = vector.multi_reduction <add>, %41, %cst_17 [1] : vector<8x128xf32> to vector<8xf32>
    %43 = vector.shape_cast %42 : vector<8xf32> to vector<8x1xf32>
    %44 = vector.extract_strided_slice %14 {offsets = [0, 1], sizes = [1, 1], strides = [1, 1]} : vector<1x128xf32> to vector<1x1xf32>
    %45 = vector.broadcast %44 : vector<1x1xf32> to vector<8x1xf32>
    %46 = arith.addf %43, %45 : vector<8x1xf32>
    %47 = tpu.concatenate %39, %46 in 1 : vector<8x1xf32>, vector<8x1xf32> -> vector<8x2xf32>
    %c0_18 = arith.constant 0 : index
    %c0_19 = arith.constant 0 : index
    %48 = vector.load %arg3[%c0_18, %c0_19] : memref<8x2xf32, #tpu.memory_space<vmem>>, vector<8x2xf32>
    tpu.vector_store %arg3[%c0_18, %c0_19], %47 {strides = array<i32>} : memref<8x2xf32, #tpu.memory_space<vmem>>, vector<8x2xf32>,
    return
  }
  func.func @transform_0(%arg0: i32) -> (i32, i32) {
    %c0_i32 = arith.constant 0 : i32
    %c0_i32_0 = arith.constant 0 : i32
    return %arg0, %c0_i32 : i32, i32
  }
  func.func @transform_1(%arg0: i32) -> (i32, i32) {
    %c0_i32 = arith.constant 0 : i32
    %c0_i32_0 = arith.constant 0 : i32
    %c0_i32_1 = arith.constant 0 : i32
    return %c0_i32, %c0_i32_0 : i32, i32
  }
  func.func @transform_2(%arg0: i32) -> (i32, i32) {
    %c0_i32 = arith.constant 0 : i32
    %c0_i32_0 = arith.constant 0 : i32
    return %arg0, %c0_i32 : i32, i32
  }
}

</mosaic_0001>

<bundles_post_ra>
// kernel: qnetwork_forward.1
= control target key start
LH: loop header
LB: loop body
LE: loop exit
PB: predicated region body
PF: predicated region fallthrough
CT: control target
= control target key end

     0   :  { %7 = vsyncpa [#allocation3], 0  ;;  %s469_s9 = smov [#allocation2]   ;;  %s527_s0 = inlined_call_operand.vmem [shape: bf16[8,16], index: 0, kind: input, shape index: {}]   ;;  %s528_s1 = inlined_call_operand.hbm [shape: bf16[288,128], index: 1, kind: input, shape index: {}]   ;;  %s529_s2 = inlined_call_operand.vmem [shape: f32[8,2], index: 2, kind: output, shape index: {}]  }
   0x1   :  { %s15_s10 = sshll.u32 %s469_s9, 4  ;;  %s445_s13 = scalar_lea.hbm %s528_s1, 2304  ;;  %s16_s10 = int_to_ptr.vmem [resolvable:$true] %s15_s10 }
   0x2   :  { %p446_p0 = scmp.ne.s32.totalorder %s528_s1, %s445_s13  ;;  %p449_p1 = scmp.lt.u32.totalorder %s445_s13, %s528_s1 }
   0x4   :  { %p451_p2 = pnand %p449_p1, %p446_p0 }
   0x6   :  { %454 = shalt.err (!%p451_p2)
}
   0x7   :  { %s455_s18 = scalar_lea.vmem %s16_s10, 2304  ;;  %p460_p4 = scmp.lt.s32.totalorder %s16_s10, %s16_s10 }
   0x8   :  { %p456_p3 = scmp.ne.s32.totalorder %s16_s10, %s455_s18  ;;  %p461_p5 = scmp.lt.s32.totalorder %s455_s18, %s455_s18 }
   0xa   :  { %p462_p6 = por %p461_p5, %p460_p4 }
   0xc   :  { %p463_p7 = pnand %p462_p6, %p456_p3 }
   0xe   :  { %466 = shalt.err (!%p463_p7)
}
   0xf   :  { %s470_s19 = smov 64   ;;  %s471_s20 = smov 4  }
  0x10   :  { %21 = dma.hbm_to_vmem [thread:$0]  %s528_s1, 2304, %s16_s10, [#allocation3], %s470_s19, %s470_s19, %s471_s20  }
  0x11   :  { %467 = dma.done.wait [#allocation3], 2304  }
  0x12   :  { %468 = vsyncadd [#allocation3], 4294964992  ;;  %v472_v0 = vmov 0.0   ;;  %vm473_vm0 = vmmov 0   ;;  %v428_v1 = vld [vmem:[#allocation2] sm:$0xff]   ;;  %vm77_vm1 = vcmask 130048   ;;  %v67_v17 = vlaneseq }
  0x13   :  { %377 = vmatprep.subr.bf16.mxu0 %v472_v0  ;;  %379 = vmatprep.mubr.msk.bf16.mxu0 %vm473_vm0, %v472_v0  ;;  %v66_v2 = vld [vmem:[%s527_s0] sm:$0xf]  ;;  %v429_v3 = vld [vmem:[#allocation2 + $0x8] sm:$0xff]   ;;  %v430_v4 = vld [vmem:[#allocation2 + $0x10] sm:$0xff]   ;;  %vm330_vm2 = vcmask 7168   ;;  %vm332_vm3 = vcmask 15360  }
  0x14   :  { %383 = vmatprep.subr.bf16.mxu1 %v472_v0  ;;  %399 = vmatprep.mubr.msk.bf16.mxu1 %vm473_vm0, %v472_v0  ;;  %v431_v5 = vld [vmem:[#allocation2 + $0x18] sm:$0xff]   ;;  %v432_v6 = vld [vmem:[#allocation2 + $0x20] sm:$0xff]   ;;  %v433_v7 = vld [vmem:[#allocation2 + $0x28] sm:$0xff]   ;;  %v68_v18 = vshrl.u32 %v67_v17, 7 }
  0x15   :  { %378 = vmatpush3.bf16.msra.mxu0 %v428_v1  ;;  %384 = vmatpush3.bf16.msra.mxu1 %v429_v3  ;;  %v434_v8 = vld [vmem:[#allocation2 + $0x30] sm:$0xff]   ;;  %v435_v9 = vld [vmem:[#allocation2 + $0x38] sm:$0xff]   ;;  %v436_v10 = vld [vmem:[#allocation2 + $0x40] sm:$0xff]  }
  0x16   :  { %403 = vmatprep.subr.bf16.mxu0 %v472_v0  ;;  %385 = vmatprep.subr.bf16.mxu1 %v472_v0  ;;  %v437_v11 = vld [vmem:[#allocation2 + $0x48] sm:$0xff]   ;;  %v438_v12 = vld [vmem:[#allocation2 + $0x50] sm:$0xff]   ;;  %v439_v13 = vld [vmem:[#allocation2 + $0x58] sm:$0xff]   ;;  %v69_v21 = vsub.s32 0, %v68_v18  ;;  %v125_v32 = vsub.s32 1, %v68_v18  ;;  %v219_v43 = vsub.s32 2, %v68_v18 }
  0x17   :  { %v440_v14 = vld [vmem:[#allocation2 + $0x60] sm:$0xff]   ;;  %v441_v15 = vld [vmem:[#allocation2 + $0x68] sm:$0xff]   ;;  %v442_v16 = vld [vmem:[#allocation2 + $0x70] sm:$0xff]   ;;  %v319_v57 = vsub.s32 3, %v68_v18 }
  0x18   :  { %380 = vmatmul.mubr.msk.bf16.vlgmr.msra.gmra.mrb[0].mxu0 %vm77_vm1, %v66_v2  ;;  %v62_v19 = vld [vmem:[#allocation2 + $0x8c] sm:$0x1]  ;;  %v443_v30 = vld [vmem:[#allocation2 + $0x78] sm:$0xff]   ;;  %v444_v31 = vld [vmem:[#allocation2 + $0x80] sm:$0xff]  }
  0x19   :  { %419 = vmatprep.mubr.msk.bf16.mxu0 %vm473_vm0, %v472_v0  ;;  %386 = vmatpush3.bf16.msra.mxu1 %v430_v4  ;;  %v63_v20 = vunpack.c.l.bf16 %v62_v19  ;;  %v64_v41 = vld [vmem:[#allocation2 + $0x8c] sm:$0x2]  ;;  %v60_v44 = vld [vmem:[#allocation2 + $0x88] sm:$0x1] }
  0x1a   :  { %387 = vmatprep.subr.bf16.mxu1 %v472_v0  ;;  %404 = vmatpush3.bf16.msra.mxu0 %v437_v11  ;;  %v65_v42 = vunpack.c.l.bf16 %v64_v41  ;;  %v61_v46 = vunpack.c.l.bf16 %v60_v44 }
  0x1b   :  { %405 = vmatprep.subr.bf16.mxu0 %v472_v0  ;;  %v70_v22 = vrot.slane %v63_v20, %v69_v21  ;;  %v126_v33 = vrot.slane %v63_v20, %v125_v32 }
  0x1c   :  { %v220_v45 = vrot.slane %v65_v42, %v219_v43  ;;  %v313_v50 = vrot.slane %v61_v46, %v69_v21  ;;  %v325_v55 = vrot.slane %v61_v46, %v125_v32  ;;  %v320_v59 = vrot.slane %v65_v42, %v319_v57 }
  0x1d   :  { %388 = vmatpush3.bf16.msra.mxu1 %v431_v5 }
  0x1e   :  { %389 = vmatprep.subr.bf16.mxu1 %v472_v0  ;;  %406 = vmatpush3.bf16.msra.mxu0 %v438_v12 }
  0x1f   :  { %407 = vmatprep.subr.bf16.mxu0 %v472_v0 }
  0x21   :  { %390 = vmatpush3.bf16.msra.mxu1 %v432_v6 }
  0x22   :  { %391 = vmatprep.subr.bf16.mxu1 %v472_v0  ;;  %408 = vmatpush3.bf16.msra.mxu0 %v439_v13 }
  0x23   :  { %409 = vmatprep.subr.bf16.mxu0 %v472_v0 }
  0x25   :  { %392 = vmatpush3.bf16.msra.mxu1 %v433_v7 }
  0x26   :  { %393 = vmatprep.subr.bf16.mxu1 %v472_v0  ;;  %410 = vmatpush3.bf16.msra.mxu0 %v440_v14 }
  0x27   :  { %411 = vmatprep.subr.bf16.mxu0 %v472_v0 }
  0x29   :  { %394 = vmatpush3.bf16.msra.mxu1 %v434_v8 }
  0x2a   :  { %395 = vmatprep.subr.bf16.mxu1 %v472_v0  ;;  %412 = vmatpush3.bf16.msra.mxu0 %v441_v15 }
  0x2b   :  { %413 = vmatprep.subr.bf16.mxu0 %v472_v0 }
  0x2d   :  { %396 = vmatpush3.bf16.msra.mxu1 %v435_v9 }
  0x2e   :  { %397 = vmatprep.subr.bf16.mxu1 %v472_v0  ;;  %414 = vmatpush3.bf16.msra.mxu0 %v442_v16 }
  0x2f   :  { %415 = vmatprep.subr.bf16.mxu0 %v472_v0 }
  0x31   :  { %398 = vmatpush3.bf16.msra.mxu1 %v436_v10 }
  0x32   :  { %416 = vmatpush3.bf16.msra.mxu0 %v443_v30 }
  0x33   :  { %417 = vmatprep.subr.bf16.mxu0 %v472_v0 }
  0x36   :  { %418 = vmatpush3.bf16.msra.mxu0 %v444_v31 }
  0xeb   :  { %v115_v23 = vpop.f32.mrb[0].mxu0 }
  0xec   :  { %v116_v24 = vadd.f32 %v115_v23, %v70_v22  ;;  %v381_v25 = vpop.f32.mrb[1].mxu0 }
  0xed   :  { %v118_v26 = vpop.f32.mrb[2].mxu0 }
  0xee   :  { %v121_v27 = vmax.f32 %v116_v24, 0.0  ;;  %v382_v28 = vpop.f32.mrb[3].mxu0 }
  0xf0   :  { %v122_v29 = vpack.c.bf16 %v121_v27, %v121_v27 }
  0xf2   :  { %400 = vmatmul.mubr.bf16.vlgmr.msra.gmra.mrb[0].mxu1 %v122_v29 }
 0x1c5   :  { %v209_v34 = vpop.f32.mrb[0].mxu1 }
 0x1c6   :  { %v210_v35 = vadd.f32 %v209_v34, %v126_v33  ;;  %v401_v36 = vpop.f32.mrb[1].mxu1 }
 0x1c7   :  { %v212_v37 = vpop.f32.mrb[2].mxu1 }
 0x1c8   :  { %v215_v38 = vmax.f32 %v210_v35, 0.0  ;;  %v402_v39 = vpop.f32.mrb[3].mxu1 }
 0x1ca   :  { %v216_v40 = vpack.c.bf16 %v215_v38, %v215_v38 }
 0x1cc   :  { %420 = vmatmul.mubr.bf16.vlgmr.msra.gmra.mrb[4].mxu0 %v216_v40 }
 0x29f   :  { %v303_v47 = vpop.f32.mrb[4].mxu0 }
 0x2a0   :  { %v304_v48 = vadd.f32 %v303_v47, %v220_v45  ;;  %v421_v49 = vpop.f32.mrb[5].mxu0 }
 0x2a1   :  { %v306_v51 = vpop.f32.mrb[6].mxu0 }
 0x2a2   :  { %v309_v52 = vmax.f32 %v304_v48, 0.0  ;;  %v422_v53 = vpop.f32.mrb[7].mxu0 }
 0x2a4   :  { %v314_v54 = vmul.f32 %v313_v50, %v309_v52  ;;  %v326_v56 = vmul.f32 %v325_v55, %v309_v52 }
 0x2a6   :  { %315 = vadd.xlane.f32.xlu0 %v314_v54 }
 0x2aa   :  { %327 = vadd.xlane.f32.xlu0 %v326_v56 }
 0x333   :  { %v316_v58 = vpop.xlane.xlu0 %315 }
 0x334   :  { %v321_v61 = vadd.f32 %v320_v59, %v316_v58 }
 0x337   :  { %v328_v60 = vpop.xlane.xlu0 %327 }
 0x338   :  { %v329_v62 = vadd.f32 %v328_v60, %v320_v59 }
 0x33a   :  { %v331_v63 = vsel %vm330_vm2, %v321_v61, %v329_v62 }
 0x33b   :  { %333 = vst.msk [vmem:[%s529_s2] sm:$0xff] %vm332_vm3, %v331_v63 }
 0x33c   :  { %338 = vsyncpa [#allocation3], 1 }

</bundles_post_ra>
